<compile_context>
chip_gen: v6e
topology: v6e:2x2x1
jax: 0.10.0
libtpu: 0.0.40
codegen_flags: <defaults>
</compile_context>

<pallas_src>
import functools

import jax
import jax.numpy as jnp
from jax import lax
from jax.experimental import pallas as pl
from jax.experimental.pallas import tpu as pltpu


# ----------------------------------------------------------------------------
# Fused Pallas kernel: full forward pass in one VMEM-resident call
# ----------------------------------------------------------------------------
def fused_gcn_kernel(num_layers, *refs):
    """refs = (e1, e2, adj1, adj2, w_0, b_0, ..., w_{L-1}, b_{L-1}, o1, o2)."""
    e1_ref, e2_ref, a1_ref, a2_ref = refs[:4]
    wb_refs = refs[4:4 + 2 * num_layers]
    o1_ref, o2_ref = refs[4 + 2 * num_layers:]

    x1 = e1_ref[...]           # (n1, D)
    x2 = e2_ref[...]           # (n2, D)
    adj1 = a1_ref[...]         # (n1, n1)
    adj2 = a2_ref[...]         # (n2, n2)

    # Static (unrolled) layer loop — both graphs share each layer's W / b.
    for l in range(num_layers):
        w = wb_refs[2 * l][...]          # (D, D)
        b = wb_refs[2 * l + 1][...]      # (1, D) -> broadcasts over rows
        s1 = jnp.dot(x1, w, preferred_element_type=jnp.float32)
        s2 = jnp.dot(x2, w, preferred_element_type=jnp.float32)
        # GCN layer: adj @ (x @ W) + b   (dropout = identity in eval mode)
        x1 = jnp.dot(adj1, s1, preferred_element_type=jnp.float32) + b
        x2 = jnp.dot(adj2, s2, preferred_element_type=jnp.float32) + b

    # Row-wise L2 normalize: x / max(||x||, 1e-12) == x * rsqrt(max(sumsq, 1e-24))
    eps2 = 1e-24
    inv1 = lax.rsqrt(jnp.maximum(jnp.sum(x1 * x1, axis=-1, keepdims=True), eps2))
    inv2 = lax.rsqrt(jnp.maximum(jnp.sum(x2 * x2, axis=-1, keepdims=True), eps2))
    o1_ref[...] = x1 * inv1
    o2_ref[...] = x2 * inv2


# ----------------------------------------------------------------------------
# Wrapper: natural shapes, single grid-less pallas_call
# ----------------------------------------------------------------------------
@jax.jit
def model_forward(emb1, emb2, adj1, adj2, weights, biases):
    n1, d = emb1.shape
    n2, _ = emb2.shape
    num_layers = len(weights)

    # Parameters at natural shape; biases reshaped to (1, D) for 2-D layout.
    wb = []
    for w, b in zip(weights, biases):
        wb.append(w.astype(jnp.float32))
        wb.append(b.astype(jnp.float32).reshape(1, d))

    vmem_spec = pl.BlockSpec(memory_space=pltpu.MemorySpace.VMEM)
    n_in = 4 + 2 * num_layers

    # Advisory cost estimate (flops = 2*M*K*N per matmul; rsqrt per row).
    flops = num_layers * 2 * (n1 * d * d + n2 * d * d
                              + n1 * n1 * d + n2 * n2 * d)
    bytes_accessed = 4 * (2 * (n1 * d + n2 * d)            # emb in + out
                          + n1 * n1 + n2 * n2              # adjacencies
                          + num_layers * (d * d + d))      # weights + biases

    kernel = functools.partial(fused_gcn_kernel, num_layers)
    o1, o2 = pl.pallas_call(
        kernel,
        out_shape=(jax.ShapeDtypeStruct((n1, d), jnp.float32),
                   jax.ShapeDtypeStruct((n2, d), jnp.float32)),
        in_specs=[vmem_spec] * n_in,
        out_specs=(vmem_spec, vmem_spec),
        cost_estimate=pl.CostEstimate(
            flops=flops,
            transcendentals=n1 + n2,
            bytes_accessed=bytes_accessed),
    )(emb1.astype(jnp.float32), emb2.astype(jnp.float32),
      adj1.astype(jnp.float32), adj2.astype(jnp.float32), *wb)

    return o1, o2


# ----------------------------------------------------------------------------
# Pure-JAX reference (for correctness check only)
# ----------------------------------------------------------------------------
def reference_forward(emb1, emb2, adj1, adj2, weights, biases):
    a1, a2 = emb1, emb2
    for w, b in zip(weights, biases):
        a1 = adj1 @ (a1 @ w) + b
        a2 = adj2 @ (a2 @ w) + b
    a1 = a1 / jnp.maximum(jnp.linalg.norm(a1, axis=-1, keepdims=True), 1e-12)
    a2 = a2 / jnp.maximum(jnp.linalg.norm(a2, axis=-1, keepdims=True), 1e-12)
    return a1, a2


# ----------------------------------------------------------------------------
# Deterministic parameter / input construction
# ----------------------------------------------------------------------------
if __name__ == "__main__":
    key = jax.random.PRNGKey(0)

    num_sr = 64          # nodes in source graph (A1.shape[0])
    num_tg = 48          # nodes in target graph (A2.shape[0])
    embedding_dim = 32
    num_layers = 2       # self.l = 2

    keys = jax.random.split(key, 8)

    # Embeddings: normal(mean=0, std=1/embedding_dim), as in init_parameters()
    emb1 = (1.0 / embedding_dim) * jax.random.normal(
        keys[0], (num_sr, embedding_dim), dtype=jnp.float32)
    emb2 = (1.0 / embedding_dim) * jax.random.normal(
        keys[1], (num_tg, embedding_dim), dtype=jnp.float32)

    # Dense (row-normalized) adjacency matrices A1, A2
    a1_raw = jax.random.uniform(keys[2], (num_sr, num_sr), dtype=jnp.float32)
    a2_raw = jax.random.uniform(keys[3], (num_tg, num_tg), dtype=jnp.float32)
    adj1 = a1_raw / jnp.sum(a1_raw, axis=-1, keepdims=True)
    adj2 = a2_raw / jnp.sum(a2_raw, axis=-1, keepdims=True)

    # GraphConvLayer parameters (shared across both graphs, per layer):
    # Xavier-uniform-like weights, zero biases.
    bound = (6.0 / (embedding_dim + embedding_dim)) ** 0.5
    weights = [
        jax.random.uniform(keys[4 + i], (embedding_dim, embedding_dim),
                           minval=-bound, maxval=bound, dtype=jnp.float32)
        for i in range(num_layers)
    ]
    biases = [jnp.zeros((embedding_dim,), dtype=jnp.float32)
              for _ in range(num_layers)]

    out1, out2 = model_forward(emb1, emb2, adj1, adj2, weights, biases)
    jax.block_until_ready((out1, out2))

    # Sanity checks: shapes, unit-norm rows, and agreement with pure-JAX ref.
    assert out1.shape == (num_sr, embedding_dim)
    assert out2.shape == (num_tg, embedding_dim)
    assert bool(jnp.allclose(jnp.linalg.norm(out1, axis=-1), 1.0, atol=1e-4))
    assert bool(jnp.allclose(jnp.linalg.norm(out2, axis=-1), 1.0, atol=1e-4))

    ref1, ref2 = reference_forward(emb1, emb2, adj1, adj2, weights, biases)
    assert bool(jnp.allclose(out1, ref1, atol=2e-3, rtol=2e-3))
    assert bool(jnp.allclose(out2, ref2, atol=2e-3, rtol=2e-3))

    print("KERNEL_OK")
</pallas_src>

<mosaic_0001>
module attributes {stable_mosaic.version = 11 : i64} {
  func.func @fused_gcn_kernel(%arg0: memref<64x32xf32, #tpu.memory_space<vmem>>, %arg1: memref<48x32xf32, #tpu.memory_space<vmem>>, %arg2: memref<64x64xf32, #tpu.memory_space<vmem>>, %arg3: memref<48x48xf32, #tpu.memory_space<vmem>>, %arg4: memref<32x32xf32, #tpu.memory_space<vmem>>, %arg5: memref<1x32xf32, #tpu.memory_space<vmem>>, %arg6: memref<32x32xf32, #tpu.memory_space<vmem>>, %arg7: memref<1x32xf32, #tpu.memory_space<vmem>>, %arg8: memref<64x32xf32, #tpu.memory_space<vmem>>, %arg9: memref<48x32xf32, #tpu.memory_space<vmem>>) attributes {dimension_semantics = [], scalar_prefetch = 0 : i64, scratch_operands = 0 : i64, tpu.core_type = #tpu.core_type<tc>} {
    %c0 = arith.constant 0 : index
    %c0_0 = arith.constant 0 : index
    %0 = vector.load %arg0[%c0, %c0_0] : memref<64x32xf32, #tpu.memory_space<vmem>>, vector<64x32xf32>
    %c0_1 = arith.constant 0 : index
    %c0_2 = arith.constant 0 : index
    %1 = vector.load %arg1[%c0_1, %c0_2] : memref<48x32xf32, #tpu.memory_space<vmem>>, vector<48x32xf32>
    %c0_3 = arith.constant 0 : index
    %c0_4 = arith.constant 0 : index
    %2 = vector.load %arg2[%c0_3, %c0_4] : memref<64x64xf32, #tpu.memory_space<vmem>>, vector<64x64xf32>
    %c0_5 = arith.constant 0 : index
    %c0_6 = arith.constant 0 : index
    %3 = vector.load %arg3[%c0_5, %c0_6] : memref<48x48xf32, #tpu.memory_space<vmem>>, vector<48x48xf32>
    %c0_7 = arith.constant 0 : index
    %c0_8 = arith.constant 0 : index
    %4 = vector.load %arg4[%c0_7, %c0_8] : memref<32x32xf32, #tpu.memory_space<vmem>>, vector<32x32xf32>
    %c0_9 = arith.constant 0 : index
    %c0_10 = arith.constant 0 : index
    %5 = vector.load %arg5[%c0_9, %c0_10] : memref<1x32xf32, #tpu.memory_space<vmem>>, vector<1x32xf32>
    %cst = arith.constant dense<0.000000e+00> : vector<64x32xf32>
    %6 = tpu.matmul %0, %4, %cst {dimension_numbers = #tpu.dot_dimension_numbers<[1], [0], [0], [1], [0, 0, 1, 1], [], []>} : vector<64x32xf32>, vector<32x32xf32>, vector<64x32xf32> -> vector<64x32xf32>
    %cst_11 = arith.constant dense<0.000000e+00> : vector<48x32xf32>
    %7 = tpu.matmul %1, %4, %cst_11 {dimension_numbers = #tpu.dot_dimension_numbers<[1], [0], [0], [1], [0, 0, 1, 1], [], []>} : vector<48x32xf32>, vector<32x32xf32>, vector<48x32xf32> -> vector<48x32xf32>
    %cst_12 = arith.constant dense<0.000000e+00> : vector<64x32xf32>
    %8 = tpu.matmul %2, %6, %cst_12 {dimension_numbers = #tpu.dot_dimension_numbers<[1], [0], [0], [1], [0, 0, 1, 1], [], []>} : vector<64x64xf32>, vector<64x32xf32>, vector<64x32xf32> -> vector<64x32xf32>
    %9 = vector.broadcast %5 : vector<1x32xf32> to vector<64x32xf32>
    %10 = arith.addf %8, %9 : vector<64x32xf32>
    %cst_13 = arith.constant dense<0.000000e+00> : vector<48x32xf32>
    %11 = tpu.matmul %3, %7, %cst_13 {dimension_numbers = #tpu.dot_dimension_numbers<[1], [0], [0], [1], [0, 0, 1, 1], [], []>} : vector<48x48xf32>, vector<48x32xf32>, vector<48x32xf32> -> vector<48x32xf32>
    %12 = vector.broadcast %5 : vector<1x32xf32> to vector<48x32xf32>
    %13 = arith.addf %11, %12 : vector<48x32xf32>
    %c0_14 = arith.constant 0 : index
    %c0_15 = arith.constant 0 : index
    %14 = vector.load %arg6[%c0_14, %c0_15] : memref<32x32xf32, #tpu.memory_space<vmem>>, vector<32x32xf32>
    %c0_16 = arith.constant 0 : index
    %c0_17 = arith.constant 0 : index
    %15 = vector.load %arg7[%c0_16, %c0_17] : memref<1x32xf32, #tpu.memory_space<vmem>>, vector<1x32xf32>
    %cst_18 = arith.constant dense<0.000000e+00> : vector<64x32xf32>
    %16 = tpu.matmul %10, %14, %cst_18 {dimension_numbers = #tpu.dot_dimension_numbers<[1], [0], [0], [1], [0, 0, 1, 1], [], []>} : vector<64x32xf32>, vector<32x32xf32>, vector<64x32xf32> -> vector<64x32xf32>
    %cst_19 = arith.constant dense<0.000000e+00> : vector<48x32xf32>
    %17 = tpu.matmul %13, %14, %cst_19 {dimension_numbers = #tpu.dot_dimension_numbers<[1], [0], [0], [1], [0, 0, 1, 1], [], []>} : vector<48x32xf32>, vector<32x32xf32>, vector<48x32xf32> -> vector<48x32xf32>
    %cst_20 = arith.constant dense<0.000000e+00> : vector<64x32xf32>
    %18 = tpu.matmul %2, %16, %cst_20 {dimension_numbers = #tpu.dot_dimension_numbers<[1], [0], [0], [1], [0, 0, 1, 1], [], []>} : vector<64x64xf32>, vector<64x32xf32>, vector<64x32xf32> -> vector<64x32xf32>
    %19 = vector.broadcast %15 : vector<1x32xf32> to vector<64x32xf32>
    %20 = arith.addf %18, %19 : vector<64x32xf32>
    %cst_21 = arith.constant dense<0.000000e+00> : vector<48x32xf32>
    %21 = tpu.matmul %3, %17, %cst_21 {dimension_numbers = #tpu.dot_dimension_numbers<[1], [0], [0], [1], [0, 0, 1, 1], [], []>} : vector<48x48xf32>, vector<48x32xf32>, vector<48x32xf32> -> vector<48x32xf32>
    %22 = vector.broadcast %15 : vector<1x32xf32> to vector<48x32xf32>
    %23 = arith.addf %21, %22 : vector<48x32xf32>
    %24 = arith.mulf %20, %20 : vector<64x32xf32>
    %cst_22 = arith.constant dense<0.000000e+00> : vector<64xf32>
    %25 = vector.multi_reduction <add>, %24, %cst_22 [1] : vector<64x32xf32> to vector<64xf32>
    %26 = vector.shape_cast %25 : vector<64xf32> to vector<64x1xf32>
    %cst_23 = arith.constant 1.000000e-24 : f32
    %27 = vector.broadcast %cst_23 : f32 to vector<64x1xf32>
    %28 = arith.maximumf %26, %27 : vector<64x1xf32>
    %29 = math.rsqrt %28 : vector<64x1xf32>
    %30 = arith.mulf %23, %23 : vector<48x32xf32>
    %cst_24 = arith.constant dense<0.000000e+00> : vector<48xf32>
    %31 = vector.multi_reduction <add>, %30, %cst_24 [1] : vector<48x32xf32> to vector<48xf32>
    %32 = vector.shape_cast %31 : vector<48xf32> to vector<48x1xf32>
    %cst_25 = arith.constant 1.000000e-24 : f32
    %33 = vector.broadcast %cst_25 : f32 to vector<48x1xf32>
    %34 = arith.maximumf %32, %33 : vector<48x1xf32>
    %35 = math.rsqrt %34 : vector<48x1xf32>
    %36 = vector.broadcast %29 : vector<64x1xf32> to vector<64x32xf32>
    %37 = arith.mulf %20, %36 : vector<64x32xf32>
    %c0_26 = arith.constant 0 : index
    %c0_27 = arith.constant 0 : index
    %38 = vector.load %arg8[%c0_26, %c0_27] : memref<64x32xf32, #tpu.memory_space<vmem>>, vector<64x32xf32>
    tpu.vector_store %arg8[%c0_26, %c0_27], %37 {strides = array<i32>} : memref<64x32xf32, #tpu.memory_space<vmem>>, vector<64x32xf32>,
    %39 = vector.broadcast %35 : vector<48x1xf32> to vector<48x32xf32>
    %40 = arith.mulf %23, %39 : vector<48x32xf32>
    %c0_28 = arith.constant 0 : index
    %c0_29 = arith.constant 0 : index
    %41 = vector.load %arg9[%c0_28, %c0_29] : memref<48x32xf32, #tpu.memory_space<vmem>>, vector<48x32xf32>
    tpu.vector_store %arg9[%c0_28, %c0_29], %40 {strides = array<i32>} : memref<48x32xf32, #tpu.memory_space<vmem>>, vector<48x32xf32>,
    return
  }
}

</mosaic_0001>

<bundles_post_ra>
// kernel: model_forward.1
= control target key start
LH: loop header
LB: loop body
LE: loop exit
PB: predicated region body
PF: predicated region fallthrough
CT: control target
= control target key end

     0   :  { %15 = vsyncpa [#allocation3], 0  ;;  %s1528_s30 = smov [#allocation2]   ;;  %s1938_s0 = inlined_call_operand.vmem [shape: f32[64,32], index: 0, kind: input, shape index: {}]   ;;  %s1939_s1 = inlined_call_operand.vmem [shape: f32[48,32], index: 1, kind: input, shape index: {}]   ;;  %s1940_s2 = inlined_call_operand.vmem [shape: f32[64,64], index: 2, kind: input, shape index: {}]   ;;  %s1941_s3 = inlined_call_operand.vmem [shape: f32[48,48], index: 3, kind: input, shape index: {}]   ;;  %s1942_s4 = inlined_call_operand.vmem [shape: f32[32,32], index: 4, kind: input, shape index: {}]   ;;  %s1943_s5 = inlined_call_operand.vmem [shape: f32[1,32], index: 5, kind: input, shape index: {}]   ;;  %s1944_s6 = inlined_call_operand.hbm [shape: f32[32,32], index: 6, kind: input, shape index: {}]   ;;  %s1945_s7 = inlined_call_operand.vmem [shape: f32[1,32], index: 7, kind: input, shape index: {}]   ;;  %s1946_s8 = inlined_call_operand.vmem [shape: f32[64,32], index: 8, kind: output, shape index: {0}]   ;;  %s1947_s9 = inlined_call_operand.vmem [shape: f32[48,32], index: 9, kind: output, shape index: {1}]  }
   0x1   :  { %s33_s10 = sshll.u32 %s1528_s30, 4  ;;  %s34_s10 = int_to_ptr.vmem [resolvable:$true] %s33_s10 }
   0x2   :  { %s1514_s11 = scalar_lea.vmem %s34_s10, 512  ;;  %p1519_p1 = scmp.lt.s32.totalorder %s34_s10, %s34_s10 }
   0x3   :  { %p1515_p0 = scmp.ne.s32.totalorder %s34_s10, %s1514_s11  ;;  %p1520_p2 = scmp.lt.s32.totalorder %s1514_s11, %s1514_s11 }
   0x5   :  { %p1521_p3 = por %p1520_p2, %p1519_p1 }
   0x7   :  { %p1522_p4 = pnand %p1521_p3, %p1515_p0 }
   0x9   :  { %1525 = shalt.err (!%p1522_p4)
}
   0xa   :  { %s1529_s12 = smov 128   ;;  %s1530_s13 = smov 8  }
   0xb   :  { %39 = dma.hbm_to_vmem [thread:$0]  %s1944_s6, 512, %s34_s10, [#allocation3], %s1529_s12, %s1529_s12, %s1530_s13  }
   0xc   :  { %1526 = dma.done.wait [#allocation3], 512  }
   0xd   :  { %1527 = vsyncadd [#allocation3], 4294966784  ;;  %v76_v0 = vld [vmem:[%s1942_s4 + $0x18] sm:$0xff]  ;;  %v75_v1 = vld [vmem:[%s1942_s4 + $0x10] sm:$0xff]  ;;  %vm78_vm0 = vcmask 261120   ;;  %vm457_vm1 = vcmask 392192  }
   0xe   :  { %1303 = vmatprep.subr.mxu0 %v76_v0  ;;  %1323 = vmatprep.subr.mxu1 %v76_v0  ;;  %v74_v2 = vld [vmem:[%s1942_s4 + $0x8] sm:$0xff]  ;;  %v73_v3 = vld [vmem:[%s1942_s4] sm:$0xff]  ;;  %v47_v8 = vld [vmem:[%s1938_s0 + $0x10] sm:$0xff]  ;;  %vm327_vm2 = vcmask 523264  }
   0xf   :  { %1304 = vmatpush3.msra.mxu0 %v76_v0  ;;  %1324 = vmatpush3.msra.mxu1 %v76_v0  ;;  %v45_v4 = vld [vmem:[%s1938_s0] sm:$0xff]  ;;  %v46_v6 = vld [vmem:[%s1938_s0 + $0x8] sm:$0xff]  ;;  %v55_v9 = vld [vmem:[%s1939_s1 + $0x10] sm:$0xff] }
  0x10   :  { %1305 = vmatprep.subr.mxu0 %v75_v1  ;;  %1325 = vmatprep.subr.mxu1 %v75_v1  ;;  %v53_v5 = vld [vmem:[%s1939_s1] sm:$0xff]  ;;  %v54_v7 = vld [vmem:[%s1939_s1 + $0x8] sm:$0xff]  ;;  %v48_v10 = vld [vmem:[%s1938_s0 + $0x18] sm:$0xff] }
  0x11   :  { %1306 = vmatpush3.msra.mxu0 %v75_v1  ;;  %1326 = vmatpush3.msra.mxu1 %v75_v1  ;;  %v56_v11 = vld [vmem:[%s1939_s1 + $0x18] sm:$0xff]  ;;  %v49_v12 = vld [vmem:[%s1938_s0 + $0x20] sm:$0xff]  ;;  %v50_v14 = vld [vmem:[%s1938_s0 + $0x28] sm:$0xff] }
  0x12   :  { %1307 = vmatprep.subr.mxu0 %v74_v2  ;;  %1327 = vmatprep.subr.mxu1 %v74_v2  ;;  %v57_v13 = vld [vmem:[%s1939_s1 + $0x20] sm:$0xff]  ;;  %v58_v15 = vld [vmem:[%s1939_s1 + $0x28] sm:$0xff]  ;;  %v51_v16 = vld [vmem:[%s1938_s0 + $0x30] sm:$0xff] }
  0x13   :  { %1308 = vmatpush3.msra.mxu0 %v74_v2  ;;  %1328 = vmatpush3.msra.mxu1 %v74_v2  ;;  %v52_v17 = vld [vmem:[%s1938_s0 + $0x38] sm:$0xff]  ;;  %v1655_v18 = vld [vmem:[%s1941_s3] sm:$0xff]  ;;  %v1669_v34 = vld [vmem:[%s1941_s3 + $0x8] sm:$0xff] }
  0x14   :  { %1309 = vmatprep.subr.mxu0 %v73_v3  ;;  %1329 = vmatprep.subr.mxu1 %v73_v3  ;;  %v1662_v19 = vld [vmem:[%s1940_s2] sm:$0xff]  ;;  %v1674_v35 = vld [vmem:[%s1941_s3 + $0x10] sm:$0xff]  ;;  %v1683_v36 = vld [vmem:[%s1941_s3 + $0x18] sm:$0xff] }
  0x15   :  { %1310 = vmatpush3.msra.mxu0 %v73_v3  ;;  %1311 = vmatprep.mubr.msk.f32.mxu0 %vm78_vm0, %v45_v4  ;;  %v574_v37 = vld [vmem:[#allocation2 + $0x18] sm:$0xff]  ;;  %v1688_v38 = vld [vmem:[%s1941_s3 + $0x20] sm:$0xff]  ;;  %v1697_v39 = vld [vmem:[%s1940_s2 + $0x8] sm:$0xff] }
  0x16   :  { %1330 = vmatpush3.msra.mxu1 %v73_v3  ;;  %1331 = vmatprep.mubr.msk.f32.mxu1 %vm78_vm0, %v53_v5  ;;  %v1702_v40 = vld [vmem:[%s1941_s3 + $0x28] sm:$0xff]  ;;  %v1707_v41 = vld [vmem:[%s1940_s2 + $0x10] sm:$0xff]  ;;  %v1718_v42 = vld [vmem:[%s1940_s2 + $0x18] sm:$0xff] }
  0x17   :  { %1312 = vmatmul.mubr.msk.f32.vlgmr.msra.gmra.mxu0 %vm78_vm0, %v46_v6  ;;  %1332 = vmatmul.mubr.msk.f32.vlgmr.msra.gmra.mxu1 %vm78_vm0, %v54_v7  ;;  %v1723_v43 = vld [vmem:[%s1940_s2 + $0x20] sm:$0xff]  ;;  %v1732_v44 = vld [vmem:[%s1940_s2 + $0x28] sm:$0xff]  ;;  %v1737_v45 = vld [vmem:[%s1940_s2 + $0x30] sm:$0xff] }
  0x18   :  { %1314 = vmatprep.mubr.msk.f32.mxu0 %vm78_vm0, %v47_v8  ;;  %1334 = vmatprep.mubr.msk.f32.mxu1 %vm78_vm0, %v55_v9  ;;  %v1746_v46 = vld [vmem:[%s1940_s2 + $0x38] sm:$0xff]  ;;  %v573_v47 = vld [vmem:[#allocation2 + $0x10] sm:$0xff]  ;;  %v572_v48 = vld [vmem:[#allocation2 + $0x8] sm:$0xff] }
  0x19   :  { %v571_v49 = vld [vmem:[#allocation2] sm:$0xff] }
  0x1a   :  { %v1159_v50 = vld [vmem:[%s1943_s5] ss:$0 sm:$0xff] }
  0x1b   :  { %1315 = vmatmul.mubr.msk.f32.gmra.mxu0 %vm78_vm0, %v48_v10  ;;  %1335 = vmatmul.mubr.msk.f32.gmra.mxu1 %vm78_vm0, %v56_v11 }
  0x1c   :  { %1317 = vmatprep.mubr.msk.f32.mxu0 %vm78_vm0, %v49_v12  ;;  %1337 = vmatprep.mubr.msk.f32.mxu1 %vm78_vm0, %v57_v13 }
  0x1f   :  { %1318 = vmatmul.mubr.msk.f32.gmra.mxu0 %vm78_vm0, %v50_v14  ;;  %1338 = vmatmul.mubr.msk.f32.gmra.mxu1 %vm78_vm0, %v58_v15 }
  0x20   :  { %1320 = vmatprep.mubr.msk.f32.mxu0 %vm78_vm0, %v51_v16  ;;  %1380 = vmatprep.mubr.msk.f32.mxu1 %vm457_vm1, %v1655_v18 }
  0x23   :  { %1321 = vmatmul.mubr.msk.f32.gmra.mxu0 %vm78_vm0, %v52_v17 }
  0x24   :  { %1356 = vmatprep.mubr.msk.f32.mxu0 %vm327_vm2, %v1662_v19 }
  0xd7   :  { %v1313_v20 = vpop.f32.mrf.mxu0  ;;  %v1333_v21 = vpop.f32.mrf.mxu1 }
  0xd9   :  { %v169_v22 = vpop.f32.mrf.mxu0  ;;  %v292_v23 = vpop.f32.mrf.mxu1 }
  0xdb   :  { %v1316_v24 = vpop.f32.mrf.mxu0  ;;  %v1336_v25 = vpop.f32.mrf.mxu1 }
  0xdd   :  { %v179_v26 = vpop.f32.mrf.mxu0  ;;  %v302_v27 = vpop.f32.mrf.mxu1 }
  0xdf   :  { %v1319_v28 = vpop.f32.mrf.mxu0  ;;  %v1339_v29 = vpop.f32.mrf.mxu1 }
  0xe0   :  { %1368 = vmatprep.subr.mxu1 %v1339_v29 }
  0xe1   :  { %v189_v30 = vpop.f32.mrf.mxu0  ;;  %v312_v31 = vpop.f32.mrf.mxu1  ;;  %1369 = vmatpush3.msra.mxu1 %v1339_v29  ;;  %v1188_v29 = vld [vmem:[%s1945_s7] ss:$0 sm:$0xff] }
  0xe2   :  { %1370 = vmatprep.subr.mxu1 %v312_v31 }
  0xe3   :  { %v1322_v32 = vpop.f32.mrf.mxu0  ;;  %1371 = vmatpush3.msra.mxu1 %v312_v31 }
  0xe4   :  { %1340 = vmatprep.subr.mxu0 %v1322_v32  ;;  %1372 = vmatprep.subr.mxu1 %v1336_v25 }
  0xe5   :  { %v199_v33 = vpop.f32.mrf.mxu0  ;;  %1341 = vmatpush3.msra.mxu0 %v1322_v32  ;;  %1373 = vmatpush3.msra.mxu1 %v1336_v25 }
  0xe6   :  { %1342 = vmatprep.subr.mxu0 %v199_v33  ;;  %1374 = vmatprep.subr.mxu1 %v302_v27 }
  0xe7   :  { %1343 = vmatpush3.msra.mxu0 %v199_v33  ;;  %1375 = vmatpush3.msra.mxu1 %v302_v27 }
  0xe8   :  { %1344 = vmatprep.subr.mxu0 %v1319_v28  ;;  %1376 = vmatprep.subr.mxu1 %v1333_v21 }
  0xe9   :  { %1345 = vmatpush3.msra.mxu0 %v1319_v28  ;;  %1377 = vmatpush3.msra.mxu1 %v1333_v21 }
  0xea   :  { %1346 = vmatprep.subr.mxu0 %v189_v30  ;;  %1378 = vmatprep.subr.mxu1 %v292_v23 }
  0xeb   :  { %1347 = vmatpush3.msra.mxu0 %v189_v30  ;;  %1379 = vmatpush3.msra.mxu1 %v292_v23 }
  0xec   :  { %1348 = vmatprep.subr.mxu0 %v1316_v24  ;;  %1381 = vmatmul.mubr.msk.f32.vlgmr.msra.gmra.mxu1 %vm457_vm1, %v1669_v34 }
  0xed   :  { %1349 = vmatpush3.msra.mxu0 %v1316_v24  ;;  %1383 = vmatprep.mubr.msk.f32.mxu1 %vm457_vm1, %v1674_v35 }
  0xee   :  { %1350 = vmatprep.subr.mxu0 %v179_v26  ;;  %1389 = vmatprep.subr.mxu1 %v574_v37 }
  0xef   :  { %1351 = vmatpush3.msra.mxu0 %v179_v26  ;;  %1390 = vmatpush3.msra.mxu1 %v574_v37 }
  0xf0   :  { %1352 = vmatprep.subr.mxu0 %v1313_v20  ;;  %1384 = vmatmul.mubr.msk.f32.gmra.mxu1 %vm457_vm1, %v1683_v36 }
  0xf1   :  { %1353 = vmatpush3.msra.mxu0 %v1313_v20  ;;  %1386 = vmatprep.mubr.msk.f32.mxu1 %vm457_vm1, %v1688_v38 }
  0xf2   :  { %1354 = vmatprep.subr.mxu0 %v169_v22  ;;  %1391 = vmatprep.subr.mxu1 %v573_v47 }
  0xf3   :  { %1355 = vmatpush3.msra.mxu0 %v169_v22  ;;  %1392 = vmatpush3.msra.mxu1 %v573_v47 }
  0xf4   :  { %1357 = vmatmul.mubr.msk.f32.vlgmr.msra.gmra.mxu0 %vm327_vm2, %v1697_v39  ;;  %1387 = vmatmul.mubr.msk.f32.gmra.mxu1 %vm457_vm1, %v1702_v40 }
  0xf5   :  { %1359 = vmatprep.mubr.msk.f32.mxu0 %vm327_vm2, %v1707_v41  ;;  %1409 = vmatprep.subr.mxu0 %v574_v37 }
  0xf6   :  { %1410 = vmatpush3.msra.mxu0 %v574_v37  ;;  %1393 = vmatprep.subr.mxu1 %v572_v48 }
  0xf7   :  { %1411 = vmatprep.subr.mxu0 %v573_v47  ;;  %1394 = vmatpush3.msra.mxu1 %v572_v48 }
  0xf8   :  { %1360 = vmatmul.mubr.msk.f32.gmra.mxu0 %vm327_vm2, %v1718_v42  ;;  %1395 = vmatprep.subr.mxu1 %v571_v49 }
  0xf9   :  { %1362 = vmatprep.mubr.msk.f32.mxu0 %vm327_vm2, %v1723_v43  ;;  %1412 = vmatpush3.msra.mxu0 %v573_v47 }
  0xfa   :  { %1413 = vmatprep.subr.mxu0 %v572_v48  ;;  %1396 = vmatpush3.msra.mxu1 %v571_v49 }
  0xfb   :  { %1414 = vmatpush3.msra.mxu0 %v572_v48 }
  0xfc   :  { %1363 = vmatmul.mubr.msk.f32.gmra.mxu0 %vm327_vm2, %v1732_v44  ;;  %1415 = vmatprep.subr.mxu0 %v571_v49 }
  0xfd   :  { %1365 = vmatprep.mubr.msk.f32.mxu0 %vm327_vm2, %v1737_v45  ;;  %1416 = vmatpush3.msra.mxu0 %v571_v49 }
 0x100   :  { %1366 = vmatmul.mubr.msk.f32.gmra.mxu0 %vm327_vm2, %v1746_v46 }
 0x1ac   :  { %v1382_v51 = vpop.f32.mrf.mxu1 }
 0x1ad   :  { %v548_v52 = vadd.f32 %v1382_v51, %v1159_v50 }
 0x1ae   :  { %v542_v53 = vpop.f32.mrf.mxu1 }
 0x1af   :  { %v543_v54 = vadd.f32 %v1159_v50, %v542_v53 }
 0x1b0   :  { %v1385_v55 = vpop.f32.mrf.mxu1 }
 0x1b1   :  { %1417 = vmatprep.mubr.msk.f32.mxu0 %vm78_vm0, %v543_v54  ;;  %v558_v56 = vadd.f32 %v1385_v55, %v1159_v50 }
 0x1b2   :  { %v552_v57 = vpop.f32.mrf.mxu1  ;;  %1418 = vmatmul.mubr.msk.f32.vlgmr.msra.gmra.mxu0 %vm78_vm0, %v548_v52 }
 0x1b3   :  { %v553_v58 = vadd.f32 %v1159_v50, %v552_v57 }
 0x1b4   :  { %v1358_v59 = vpop.f32.mrf.mxu0  ;;  %v1388_v60 = vpop.f32.mrf.mxu1 }
 0x1b5   :  { %1420 = vmatprep.mubr.msk.f32.mxu0 %vm78_vm0, %v553_v58  ;;  %v568_v61 = vadd.f32 %v1388_v60, %v1159_v50  ;;  %v424_v2 = vadd.f32 %v1358_v59, %v1159_v50 }
 0x1b6   :  { %v418_v62 = vpop.f32.mrf.mxu0  ;;  %v562_v63 = vpop.f32.mrf.mxu1  ;;  %1421 = vmatmul.mubr.msk.f32.gmra.mxu0 %vm78_vm0, %v558_v56 }
 0x1b7   :  { %v419_v0 = vadd.f32 %v1159_v50, %v418_v62  ;;  %v563_v1 = vadd.f32 %v1159_v50, %v562_v63 }
 0x1b8   :  { %v1361_v3 = vpop.f32.mrf.mxu0 }
 0x1b9   :  { %1397 = vmatprep.mubr.msk.f32.mxu1 %vm78_vm0, %v419_v0  ;;  %1423 = vmatprep.mubr.msk.f32.mxu0 %vm78_vm0, %v563_v1  ;;  %v434_v6 = vadd.f32 %v1361_v3, %v1159_v50 }
 0x1ba   :  { %v428_v4 = vpop.f32.mrf.mxu0  ;;  %1398 = vmatmul.mubr.msk.f32.vlgmr.msra.gmra.mxu1 %vm78_vm0, %v424_v2  ;;  %1424 = vmatmul.mubr.msk.f32.gmra.mxu0 %vm78_vm0, %v568_v61 }
 0x1bb   :  { %v429_v5 = vadd.f32 %v1159_v50, %v428_v4  ;;  %1466 = vmatprep.mubr.msk.f32.mxu0 %vm457_vm1, %v1655_v18 }
 0x1bc   :  { %v1364_v7 = vpop.f32.mrf.mxu0 }
 0x1bd   :  { %1400 = vmatprep.mubr.msk.f32.mxu1 %vm78_vm0, %v429_v5  ;;  %v444_v10 = vadd.f32 %v1364_v7, %v1159_v50 }
 0x1be   :  { %v438_v8 = vpop.f32.mrf.mxu0  ;;  %1401 = vmatmul.mubr.msk.f32.gmra.mxu1 %vm78_vm0, %v434_v6 }
 0x1bf   :  { %v439_v9 = vadd.f32 %v1159_v50, %v438_v8 }
 0x1c0   :  { %v1367_v11 = vpop.f32.mrf.mxu0 }
 0x1c1   :  { %1403 = vmatprep.mubr.msk.f32.mxu1 %vm78_vm0, %v439_v9  ;;  %v454_v14 = vadd.f32 %v1367_v11, %v1159_v50 }
 0x1c2   :  { %v448_v12 = vpop.f32.mrf.mxu0  ;;  %1404 = vmatmul.mubr.msk.f32.gmra.mxu1 %vm78_vm0, %v444_v10 }
 0x1c3   :  { %v449_v13 = vadd.f32 %v1159_v50, %v448_v12 }
 0x1c5   :  { %1406 = vmatprep.mubr.msk.f32.mxu1 %vm78_vm0, %v449_v13 }
 0x1c6   :  { %1407 = vmatmul.mubr.msk.f32.gmra.mxu1 %vm78_vm0, %v454_v14 }
 0x1c7   :  { %1442 = vmatprep.mubr.msk.f32.mxu1 %vm327_vm2, %v1662_v19 }
 0x272   :  { %v1419_v15 = vpop.f32.mrf.mxu0 }
 0x274   :  { %v789_v16 = vpop.f32.mrf.mxu0 }
 0x276   :  { %v1422_v17 = vpop.f32.mrf.mxu0 }
 0x278   :  { %v799_v18 = vpop.f32.mrf.mxu0 }
 0x27a   :  { %v1399_v20 = vpop.f32.mrf.mxu1  ;;  %v1425_v21 = vpop.f32.mrf.mxu0 }
 0x27b   :  { %1454 = vmatprep.subr.mxu0 %v1425_v21 }
 0x27c   :  { %v666_v22 = vpop.f32.mrf.mxu1  ;;  %v809_v23 = vpop.f32.mrf.mxu0  ;;  %1455 = vmatpush3.msra.mxu0 %v1425_v21 }
 0x27d   :  { %1456 = vmatprep.subr.mxu0 %v809_v23 }
 0x27e   :  { %v1402_v24 = vpop.f32.mrf.mxu1  ;;  %1457 = vmatpush3.msra.mxu0 %v809_v23 }
 0x27f   :  { %1458 = vmatprep.subr.mxu0 %v1422_v17 }
 0x280   :  { %v676_v25 = vpop.f32.mrf.mxu1  ;;  %1459 = vmatpush3.msra.mxu0 %v1422_v17 }
 0x281   :  { %1460 = vmatprep.subr.mxu0 %v799_v18 }
 0x282   :  { %v1405_v26 = vpop.f32.mrf.mxu1  ;;  %1461 = vmatpush3.msra.mxu0 %v799_v18 }
 0x283   :  { %1462 = vmatprep.subr.mxu0 %v1419_v15 }
 0x284   :  { %v686_v19 = vpop.f32.mrf.mxu1  ;;  %1463 = vmatpush3.msra.mxu0 %v1419_v15 }
 0x285   :  { %1464 = vmatprep.subr.mxu0 %v789_v16 }
 0x286   :  { %v1408_v27 = vpop.f32.mrf.mxu1  ;;  %1465 = vmatpush3.msra.mxu0 %v789_v16 }
 0x287   :  { %1426 = vmatprep.subr.mxu1 %v1408_v27  ;;  %1467 = vmatmul.mubr.msk.f32.vlgmr.msra.gmra.mxu0 %vm457_vm1, %v1669_v34 }
 0x288   :  { %v696_v28 = vpop.f32.mrf.mxu1  ;;  %1427 = vmatpush3.msra.mxu1 %v1408_v27  ;;  %1469 = vmatprep.mubr.msk.f32.mxu0 %vm457_vm1, %v1674_v35 }
 0x289   :  { %1428 = vmatprep.subr.mxu1 %v696_v28 }
 0x28a   :  { %1429 = vmatpush3.msra.mxu1 %v696_v28 }
 0x28b   :  { %1430 = vmatprep.subr.mxu1 %v1405_v26  ;;  %1470 = vmatmul.mubr.msk.f32.gmra.mxu0 %vm457_vm1, %v1683_v36 }
 0x28c   :  { %1431 = vmatpush3.msra.mxu1 %v1405_v26  ;;  %1472 = vmatprep.mubr.msk.f32.mxu0 %vm457_vm1, %v1688_v38 }
 0x28d   :  { %1432 = vmatprep.subr.mxu1 %v686_v19 }
 0x28e   :  { %1433 = vmatpush3.msra.mxu1 %v686_v19 }
 0x28f   :  { %1434 = vmatprep.subr.mxu1 %v1402_v24  ;;  %1473 = vmatmul.mubr.msk.f32.gmra.mxu0 %vm457_vm1, %v1702_v40 }
 0x290   :  { %1435 = vmatpush3.msra.mxu1 %v1402_v24 }
 0x291   :  { %1436 = vmatprep.subr.mxu1 %v676_v25 }
 0x292   :  { %1437 = vmatpush3.msra.mxu1 %v676_v25 }
 0x293   :  { %1438 = vmatprep.subr.mxu1 %v1399_v20 }
 0x294   :  { %1439 = vmatpush3.msra.mxu1 %v1399_v20 }
 0x295   :  { %1440 = vmatprep.subr.mxu1 %v666_v22 }
 0x296   :  { %1441 = vmatpush3.msra.mxu1 %v666_v22 }
 0x297   :  { %1443 = vmatmul.mubr.msk.f32.vlgmr.msra.gmra.mxu1 %vm327_vm2, %v1697_v39 }
 0x298   :  { %1445 = vmatprep.mubr.msk.f32.mxu1 %vm327_vm2, %v1707_v41 }
 0x29b   :  { %1446 = vmatmul.mubr.msk.f32.gmra.mxu1 %vm327_vm2, %v1718_v42 }
 0x29c   :  { %1448 = vmatprep.mubr.msk.f32.mxu1 %vm327_vm2, %v1723_v43 }
 0x29f   :  { %1449 = vmatmul.mubr.msk.f32.gmra.mxu1 %vm327_vm2, %v1732_v44 }
 0x2a0   :  { %1451 = vmatprep.mubr.msk.f32.mxu1 %vm327_vm2, %v1737_v45 }
 0x2a3   :  { %1452 = vmatmul.mubr.msk.f32.gmra.mxu1 %vm327_vm2, %v1746_v46 }
 0x347   :  { %v1468_v30 = vpop.f32.mrf.mxu0 }
 0x348   :  { %v1798_v31 = vadd.f32 %v1468_v30, %v1188_v29 }
 0x349   :  { %v995_v32 = vpop.f32.mrf.mxu0 }
 0x34a   :  { %v1800_v33 = vadd.f32 %v1188_v29, %v995_v32  ;;  %v1073_v34 = vmul.f32 %v1798_v31, %v1798_v31 }
 0x34b   :  { %v1471_v35 = vpop.f32.mrf.mxu0 }
 0x34c   :  { %v1804_v36 = vadd.f32 %v1471_v35, %v1188_v29  ;;  %v1081_v37 = vsel %vm78_vm0, %v1073_v34, 0.0  ;;  %v1072_v38 = vmul.f32 %v1800_v33, %v1800_v33 }
 0x34d   :  { %1082 = vadd.xlane.f32.xlu1 %v1081_v37  ;;  %v1005_v39 = vpop.f32.mrf.mxu0 }
 0x34e   :  { %v1809_v40 = vadd.f32 %v1188_v29, %v1005_v39  ;;  %v1078_v41 = vsel %vm78_vm0, %v1072_v38, 0.0  ;;  %v1075_v42 = vmul.f32 %v1804_v36, %v1804_v36 }
 0x34f   :  { %1079 = vadd.xlane.f32.xlu0 %v1078_v41  ;;  %v1474_v55 = vpop.f32.mrf.mxu0 }
 0x350   :  { %v1087_v43 = vsel %vm78_vm0, %v1075_v42, 0.0  ;;  %v1074_v44 = vmul.f32 %v1809_v40, %v1809_v40  ;;  %v1853_v12 = vadd.f32 %v1474_v55, %v1188_v29 }
 0x351   :  { %1088 = vadd.xlane.f32.xlu1 %v1087_v43  ;;  %v1015_v0 = vpop.f32.mrf.mxu0 }
 0x352   :  { %v1084_v45 = vsel %vm78_vm0, %v1074_v44, 0.0  ;;  %v1841_v4 = vadd.f32 %v1188_v29, %v1015_v0  ;;  %v1077_v21 = vmul.f32 %v1853_v12, %v1853_v12 }
 0x353   :  { %1085 = vadd.xlane.f32.xlu0 %v1084_v45 }
 0x354   :  { %v1076_v16 = vmul.f32 %v1841_v4, %v1841_v4  ;;  %v1093_v22 = vsel %vm78_vm0, %v1077_v21, 0.0 }
 0x356   :  { %v1090_v20 = vsel %vm78_vm0, %v1076_v16, 0.0 }
 0x357   :  { %v1444_v46 = vpop.f32.mrf.mxu1 }
 0x358   :  { %v1818_v47 = vadd.f32 %v1444_v46, %v1188_v29 }
 0x359   :  { %v890_v48 = vpop.f32.mrf.mxu1 }
 0x35a   :  { %v1820_v49 = vadd.f32 %v1188_v29, %v890_v48  ;;  %v1025_v50 = vmul.f32 %v1818_v47, %v1818_v47 }
 0x35b   :  { %v1447_v51 = vpop.f32.mrf.mxu1 }
 0x35c   :  { %v1824_v52 = vadd.f32 %v1447_v51, %v1188_v29  ;;  %v1035_v53 = vsel %vm78_vm0, %v1025_v50, 0.0  ;;  %v1024_v54 = vmul.f32 %v1820_v49, %v1820_v49 }
 0x35d   :  { %1036 = vadd.xlane.f32.xlu0 %v1035_v53  ;;  %v900_v56 = vpop.f32.mrf.mxu1 }
 0x35e   :  { %v1829_v57 = vadd.f32 %v1188_v29, %v900_v56  ;;  %v1027_v58 = vmul.f32 %v1824_v52, %v1824_v52  ;;  %v1032_v62 = vsel %vm78_vm0, %v1024_v54, 0.0 }
 0x35f   :  { %v1450_v59 = vpop.f32.mrf.mxu1 }
 0x360   :  { %v1833_v60 = vadd.f32 %v1450_v59, %v1188_v29  ;;  %v1041_v61 = vsel %vm78_vm0, %v1027_v58, 0.0  ;;  %v1026_v63 = vmul.f32 %v1829_v57, %v1829_v57 }
 0x361   :  { %1042 = vadd.xlane.f32.xlu1 %v1041_v61  ;;  %v910_v1 = vpop.f32.mrf.mxu1  ;;  %1033 = vadd.xlane.f32.xlu0 %v1032_v62 }
 0x362   :  { %v1839_v2 = vadd.f32 %v1188_v29, %v910_v1  ;;  %v1038_v6 = vsel %vm78_vm0, %v1026_v63, 0.0  ;;  %v1029_v8 = vmul.f32 %v1833_v60, %v1833_v60 }
 0x363   :  { %v1453_v3 = vpop.f32.mrf.mxu1 }
 0x364   :  { %v1843_v5 = vadd.f32 %v1453_v3, %v1188_v29  ;;  %v1028_v7 = vmul.f32 %v1839_v2, %v1839_v2  ;;  %v1047_v13 = vsel %vm78_vm0, %v1029_v8, 0.0 }
 0x365   :  { %v920_v9 = vpop.f32.mrf.mxu1  ;;  %1039 = vadd.xlane.f32.xlu1 %v1038_v6 }
 0x366   :  { %v1850_v10 = vadd.f32 %v1188_v29, %v920_v9  ;;  %v1044_v11 = vsel %vm78_vm0, %v1028_v7, 0.0  ;;  %v1031_v15 = vmul.f32 %v1843_v5, %v1843_v5 }
 0x367   :  { %1045 = vadd.xlane.f32.xlu0 %v1044_v11 }
 0x368   :  { %v1030_v14 = vmul.f32 %v1850_v10, %v1850_v10  ;;  %v1053_v18 = vsel %vm78_vm0, %v1031_v15, 0.0 }
 0x369   :  { %1048 = vadd.xlane.f32.xlu1 %v1047_v13 }
 0x36a   :  { %v1050_v17 = vsel %vm78_vm0, %v1030_v14, 0.0 }
 0x36b   :  { %1051 = vadd.xlane.f32.xlu0 %v1050_v17 }
 0x36d   :  { %1054 = vadd.xlane.f32.xlu1 %v1053_v18 }
 0x36f   :  { %1091 = vadd.xlane.f32.xlu0 %v1090_v20 }
 0x371   :  { %1094 = vadd.xlane.f32.xlu1 %v1093_v22 }
 0x3d6   :  { %v1083_v23 = vpop.xlane.xlu1 %1082 }
 0x3d7   :  { %v1097_v24 = vmax.f32 %v1083_v23, 1e-24 }
 0x3d8   :  { %v1080_v25 = vpop.xlane.xlu0 %1079 }
 0x3d9   :  { %1478 = vrsqrt.f32 %v1097_v24  ;;  %v1096_v26 = vmax.f32 %v1080_v25, 1e-24 }
 0x3da   :  { %v1089_v19 = vpop.xlane.xlu1 %1088 }
 0x3db   :  { %1480 = vrsqrt.f32 %v1096_v26  ;;  %v1099_v27 = vmax.f32 %v1089_v19, 1e-24 }
 0x3dc   :  { %v1086_v28 = vpop.xlane.xlu0 %1085 }
 0x3dd   :  { %1482 = vrsqrt.f32 %v1099_v27  ;;  %v1098_v29 = vmax.f32 %v1086_v28, 1e-24 }
 0x3df   :  { %1484 = vrsqrt.f32 %v1098_v29 }
 0x3e6   :  { %v1479_v30 = vpop.eup %1478  ;;  %v1037_v32 = vpop.xlane.xlu0 %1036 }
 0x3e7   :  { %v1125_v34 = vmul.f32 %v1479_v30, %v1798_v31  ;;  %v1057_v35 = vmax.f32 %v1037_v32, 1e-24 }
 0x3e8   :  { %v1481_v37 = vpop.eup %1480 }
 0x3e9   :  { %1131 = vst.msk [vmem:[%s1947_s9 + $0x8] sm:$0xff] %vm78_vm0, %v1125_v34  ;;  %v1124_v38 = vmul.f32 %v1481_v37, %v1800_v33  ;;  %1486 = vrsqrt.f32 %v1057_v35 }
 0x3ea   :  { %v1483_v39 = vpop.eup %1482  ;;  %v1043_v41 = vpop.xlane.xlu1 %1042 }
 0x3eb   :  { %v1034_v42 = vpop.xlane.xlu0 %1033  ;;  %1130 = vst.msk [vmem:[%s1947_s9] sm:$0xff] %vm78_vm0, %v1124_v38  ;;  %v1127_v31 = vmul.f32 %v1483_v39, %v1804_v36  ;;  %v1059_v43 = vmax.f32 %v1043_v41, 1e-24 }
 0x3ec   :  { %v1056_v44 = vmax.f32 %v1034_v42, 1e-24  ;;  %v1485_v45 = vpop.eup %1484 }
 0x3ed   :  { %1133 = vst.msk [vmem:[%s1947_s9 + $0x18] sm:$0xff] %vm78_vm0, %v1127_v31  ;;  %v1126_v33 = vmul.f32 %v1485_v45, %v1809_v40  ;;  %1488 = vrsqrt.f32 %v1059_v43 }
 0x3ee   :  { %1490 = vrsqrt.f32 %v1056_v44  ;;  %v1040_v46 = vpop.xlane.xlu1 %1039 }
 0x3ef   :  { %1132 = vst.msk [vmem:[%s1947_s9 + $0x10] sm:$0xff] %vm78_vm0, %v1126_v33  ;;  %v1058_v48 = vmax.f32 %v1040_v46, 1e-24 }
 0x3f0   :  { %v1046_v36 = vpop.xlane.xlu0 %1045 }
 0x3f1   :  { %1492 = vrsqrt.f32 %v1058_v48  ;;  %v1060_v50 = vmax.f32 %v1046_v36, 1e-24 }
 0x3f2   :  { %v1049_v51 = vpop.xlane.xlu1 %1048 }
 0x3f3   :  { %1494 = vrsqrt.f32 %v1060_v50  ;;  %v1061_v53 = vmax.f32 %v1049_v51, 1e-24 }
 0x3f4   :  { %v1052_v54 = vpop.xlane.xlu0 %1051 }
 0x3f5   :  { %1496 = vrsqrt.f32 %v1061_v53  ;;  %v1062_v55 = vmax.f32 %v1052_v54, 1e-24 }
 0x3f6   :  { %v1487_v56 = vpop.eup %1486  ;;  %v1055_v40 = vpop.xlane.xlu1 %1054 }
 0x3f7   :  { %v1109_v58 = vmul.f32 %v1487_v56, %v1818_v47  ;;  %1498 = vrsqrt.f32 %v1062_v55  ;;  %v1063_v59 = vmax.f32 %v1055_v40, 1e-24 }
 0x3f8   :  { %v1092_v61 = vpop.xlane.xlu0 %1091 }
 0x3f9   :  { %1117 = vst.msk [vmem:[%s1946_s8 + $0x8] sm:$0xff] %vm78_vm0, %v1109_v58  ;;  %1500 = vrsqrt.f32 %v1063_v59  ;;  %v1100_v62 = vmax.f32 %v1092_v61, 1e-24 }
 0x3fa   :  { %v1489_v63 = vpop.eup %1488  ;;  %v1095_v0 = vpop.xlane.xlu1 %1094 }
 0x3fb   :  { %v1491_v1 = vpop.eup %1490  ;;  %v1111_v3 = vmul.f32 %v1489_v63, %v1824_v52  ;;  %1502 = vrsqrt.f32 %v1100_v62  ;;  %v1101_v6 = vmax.f32 %v1095_v0, 1e-24 }
 0x3fc   :  { %v1108_v7 = vmul.f32 %v1491_v1, %v1820_v49 }
 0x3fd   :  { %1119 = vst.msk [vmem:[%s1946_s8 + $0x18] sm:$0xff] %vm78_vm0, %v1111_v3  ;;  %1504 = vrsqrt.f32 %v1101_v6 }
 0x3fe   :  { %v1493_v47 = vpop.eup %1492  ;;  %1116 = vst.msk [vmem:[%s1946_s8] sm:$0xff] %vm78_vm0, %v1108_v7 }
 0x3ff   :  { %v1110_v8 = vmul.f32 %v1493_v47, %v1829_v57 }
 0x400   :  { %v1495_v9 = vpop.eup %1494 }
 0x401   :  { %1118 = vst.msk [vmem:[%s1946_s8 + $0x10] sm:$0xff] %vm78_vm0, %v1110_v8  ;;  %v1112_v49 = vmul.f32 %v1495_v9, %v1839_v2 }
 0x402   :  { %v1497_v52 = vpop.eup %1496 }
 0x403   :  { %1120 = vst.msk [vmem:[%s1946_s8 + $0x20] sm:$0xff] %vm78_vm0, %v1112_v49  ;;  %v1113_v11 = vmul.f32 %v1497_v52, %v1833_v60 }
 0x404   :  { %v1499_v13 = vpop.eup %1498 }
 0x405   :  { %1121 = vst.msk [vmem:[%s1946_s8 + $0x28] sm:$0xff] %vm78_vm0, %v1113_v11  ;;  %v1114_v57 = vmul.f32 %v1499_v13, %v1850_v10 }
 0x406   :  { %v1501_v14 = vpop.eup %1500 }
 0x407   :  { %1122 = vst.msk [vmem:[%s1946_s8 + $0x30] sm:$0xff] %vm78_vm0, %v1114_v57  ;;  %v1115_v2 = vmul.f32 %v1501_v14, %v1843_v5 }
 0x408   :  { %v1503_v15 = vpop.eup %1502 }
 0x409   :  { %1123 = vst.msk [vmem:[%s1946_s8 + $0x38] sm:$0xff] %vm78_vm0, %v1115_v2  ;;  %v1128_v60 = vmul.f32 %v1503_v15, %v1841_v4 }
 0x40a   :  { %v1505_v16 = vpop.eup %1504 }
 0x40b   :  { %1134 = vst.msk [vmem:[%s1947_s9 + $0x20] sm:$0xff] %vm78_vm0, %v1128_v60  ;;  %v1129_v10 = vmul.f32 %v1505_v16, %v1853_v12 }
 0x40d   :  { %1135 = vst.msk [vmem:[%s1947_s9 + $0x28] sm:$0xff] %vm78_vm0, %v1129_v10 }
 0x40e   :  { %1144 = vsyncpa [#allocation3], 1 }

</bundles_post_ra>
